<compile_context>
chip_gen: v7x
topology: tpu7x:2x2x1
jax: 0.10.0
libtpu: 0.0.40
codegen_flags: <defaults>
</compile_context>

<pallas_src>
import numpy as np

import jax
import jax.numpy as jnp
from jax.experimental import pallas as pl
from jax.experimental.pallas import tpu as pltpu

DEGREE = 3
NUM_COEFF = 10
NUM_KNOTS = NUM_COEFF + DEGREE + 1          # 14
KNOT_SCALE = float(NUM_COEFF + DEGREE)      # 13.0 ; knot m is m / 13
NUM_INTERVALS = NUM_COEFF - DEGREE          # 7 base intervals: j = 3 .. 9

_LANES = 128
_MAX_BLOCK_ROWS = 4096                      # 4096*128*4B = 2 MiB per f32 buffer


def _xmul(poly):
    """Multiply a degree-<=2 monomial-coefficient polynomial (length 4) by x."""
    out = np.zeros(4, dtype=np.float64)
    out[1:] = poly[:3]
    return out


def _build_local_basis_table():
    """table[j-3, r, k] = coeff of u^k of B_{j-3+r,3}(x) restricted to [t_j, t_{j+1}),
    expressed in the local variable u = 13*x - j (u in [0, 1) inside the interval).

    Built with the de Boor "nonzero basis functions" recursion carried out on
    polynomials; the recursion is affine-invariant, so local knots are m - j.
    """
    p = DEGREE
    table = np.zeros((NUM_INTERVALS, p + 1, p + 1), dtype=np.float64)
    for j in range(p, NUM_COEFF):
        s = [float(m - j) for m in range(NUM_KNOTS)]        # knots in local coords
        basis = [np.array([1.0, 0.0, 0.0, 0.0])]
        for deg in range(1, p + 1):
            saved = np.zeros(4, dtype=np.float64)
            new_basis = []
            for r in range(deg):
                denom = s[j + r + 1] - s[j + r + 1 - deg]
                temp = basis[r] / denom
                # right = s[j+r+1] - u ; left = u - s[j+1-deg+r]
                new_basis.append(saved + s[j + r + 1] * temp - _xmul(temp))
                saved = _xmul(temp) - s[j + 1 - deg + r] * temp
            new_basis.append(saved)
            basis = new_basis
        for r in range(p + 1):
            table[j - p, r, :] = basis[r]
    return table


_BASIS_TABLE = _build_local_basis_table()    # (7, 4, 4), float64
# Sanity: partition of unity -> sum_r B_{j-3+r,3}(u) == 1 on every interval.
assert np.allclose(
    _BASIS_TABLE.sum(axis=1),
    np.tile(np.array([1.0, 0.0, 0.0, 0.0]), (NUM_INTERVALS, 1)),
    atol=1e-9,
)
# Coefficient gather indices: interval j uses c[j-3 .. j].
_C_IDX = np.array(
    [[j + r for r in range(DEGREE + 1)] for j in range(NUM_INTERVALS)], dtype=np.int32
)                                            # (7, 4)


def _kan_kernel(params_ref, x_ref, o_ref):
    # params_ref (SMEM f32[30]) = [w_basis, w_spline, D[0,0..3], D[1,0..3], ..., D[6,0..3]]
    x = x_ref[...]

    # Hoist every SMEM scalar read once.
    w_basis = params_ref[0]
    w_spline = params_ref[1]
    dcoef = [[params_ref[2 + 4 * j + k] for k in range(4)] for j in range(NUM_INTERVALS)]

    # silu(x) = x * sigmoid(x); exp and the reciprocal both run on the EUP slot.
    silu = x * pl.reciprocal(1.0 + jnp.exp(-x), approx=True)

    # Interval: knot m is m/13, so interval j  <=>  j <= 13*x < j+1, clamped to [3, 9]
    # (clamping == scipy extrapolate=True boundary-piece extrapolation).
    xs = x * KNOT_SCALE
    jf = jnp.clip(jnp.floor(xs), float(DEGREE), float(NUM_COEFF - 1))
    u = xs - jf                               # local parameter of the selected interval

    # Per-element selection of the 4 local cubic coefficients (6 shared compares,
    # 24 selects), then a single Horner cubic in u.
    masks = [xs >= float(j) for j in range(DEGREE + 1, NUM_COEFF)]   # thresholds 4..9
    sel = []
    for k in range(4):
        v = jnp.full(x.shape, dcoef[0][k], dtype=x.dtype)            # interval 3 default
        for i in range(NUM_INTERVALS - 1):                           # override 4..9
            v = jnp.where(masks[i], dcoef[i + 1][k], v)
        sel.append(v)
    spline = ((sel[3] * u + sel[2]) * u + sel[1]) * u + sel[0]

    o_ref[...] = w_basis * silu + w_spline * spline


@jax.jit
def residual_activation(x, coefficients, w_basis, w_spline):
    """phi(x) = w_basis*silu(x) + w_spline*BSpline(knots, coefficients, 3)(x); x is 1-D."""
    x = x.astype(jnp.float32)
    n = x.shape[0]

    # Lane-dense layout: pad to (rows, 128) with rows a multiple of 8; big row blocks
    # amortize per-grid-step overhead; multiple blocks keep v7x's two TCs busy for big N.
    rows = -(-n // _LANES)
    rows = -(-rows // 8) * 8
    block_rows = min(_MAX_BLOCK_ROWS, rows)
    num_blocks = -(-rows // block_rows)
    padded_rows = num_blocks * block_rows
    padded = padded_rows * _LANES
    x2d = jnp.pad(x, (0, padded - n)).reshape(padded_rows, _LANES)

    # Collapse the spline into per-interval local cubics:
    #   D[j, k] = sum_r c[j+r] * BASIS[j, r, k]   (elementwise mul+sum: stays full f32)
    table = jnp.asarray(_BASIS_TABLE, dtype=jnp.float32)             # (7, 4, 4)
    c_sel = coefficients.astype(jnp.float32)[_C_IDX]                 # (7, 4)
    d_tab = jnp.sum(c_sel[:, :, None] * table, axis=1)               # (7, 4)

    params = jnp.concatenate(
        [w_basis.reshape(-1), w_spline.reshape(-1), d_tab.reshape(-1)]
    ).astype(jnp.float32)                                            # (30,)

    cost = pl.CostEstimate(
        flops=48 * padded,
        transcendentals=2 * padded,
        bytes_accessed=8 * padded + 4 * params.shape[0],
    )

    out2d = pl.pallas_call(
        _kan_kernel,
        out_shape=jax.ShapeDtypeStruct((padded_rows, _LANES), jnp.float32),
        grid=(num_blocks,),
        in_specs=[
            pl.BlockSpec(memory_space=pltpu.MemorySpace.SMEM),       # params (whole array)
            pl.BlockSpec((block_rows, _LANES), lambda i: (i, 0)),    # x row-block
        ],
        out_specs=pl.BlockSpec((block_rows, _LANES), lambda i: (i, 0)),
        compiler_params=pltpu.CompilerParams(
            dimension_semantics=("parallel",),
        ),
        cost_estimate=cost,
    )(params, x2d)

    return out2d.reshape(-1)[:n]


def _phi_reference(x, coefficients, w_basis, w_spline):
    """float64 reference: silu + de Boor B-spline with scipy-style extrapolation."""
    t = np.array([m / KNOT_SCALE for m in range(NUM_KNOTS)], dtype=np.float64)
    c = np.asarray(coefficients, dtype=np.float64)
    p = DEGREE
    xv = np.asarray(x, dtype=np.float64)
    spl = np.empty_like(xv)
    for i, u in enumerate(xv):
        k = int(np.searchsorted(t, u, side="right")) - 1
        k = min(max(k, p), len(c) - 1)          # clamp == extrapolate with boundary piece
        d = [c[k - p + j] for j in range(p + 1)]
        for r in range(1, p + 1):
            for j in range(p, r - 1, -1):
                alpha = (u - t[j + k - p]) / (t[j + 1 + k - r] - t[j + k - p])
                d[j] = (1.0 - alpha) * d[j - 1] + alpha * d[j]
        spl[i] = d[p]
    silu = xv / (1.0 + np.exp(-xv))
    wb = float(np.asarray(w_basis).reshape(-1)[0])
    ws = float(np.asarray(w_spline).reshape(-1)[0])
    return wb * silu + ws * spl


if __name__ == "__main__":
    key = jax.random.PRNGKey(0)
    k_x, k_x2, k_wb, k_c = jax.random.split(key, 4)

    # Shapes from __init__: coefficients (10,), w_basis (1,) ~ U(-1,1), w_spline (1,) = 1.
    # Coefficients drawn nonzero so the spline path actually exercises the kernel.
    coefficients = jax.random.normal(k_c, (NUM_COEFF,), dtype=jnp.float32)
    w_basis = jax.random.uniform(k_wb, (1,), jnp.float32, minval=-1.0, maxval=1.0)
    w_spline = jnp.ones((1,), jnp.float32)

    # Small 1-D input (seq=8) spanning inside AND outside the base interval
    # [3/13, 10/13] to exercise the clamped-interval (extrapolation) path.
    x = jax.random.uniform(k_x, (8,), jnp.float32, minval=-0.5, maxval=1.5)

    out = jax.block_until_ready(residual_activation(x, coefficients, w_basis, w_spline))
    assert out.shape == x.shape and out.dtype == jnp.float32
    assert bool(jnp.all(jnp.isfinite(out)))
    ref = _phi_reference(x, coefficients, w_basis, w_spline)
    assert np.allclose(np.asarray(out), ref, rtol=5e-3, atol=5e-3)

    # Spline-only path (w_basis = 0): tighter check, no approximate reciprocal involved.
    zero_w = jnp.zeros((1,), jnp.float32)
    out_spl = jax.block_until_ready(residual_activation(x, coefficients, zero_w, w_spline))
    ref_spl = _phi_reference(x, coefficients, zero_w, w_spline)
    assert np.allclose(np.asarray(out_spl), ref_spl, rtol=1e-3, atol=1e-3)

    # Pure-silu path (zero spline coefficients): phi must reduce to w_basis * silu(x).
    out_silu = jax.block_until_ready(
        residual_activation(x, jnp.zeros((NUM_COEFF,), jnp.float32), w_basis, w_spline)
    )
    x_np = np.asarray(x, dtype=np.float64)
    silu_ref = float(w_basis[0]) * (x_np / (1.0 + np.exp(-x_np)))
    assert np.allclose(np.asarray(out_silu), silu_ref, rtol=5e-3, atol=5e-3)

    # Larger 1-D input: exercises padding and multi-row lane-dense blocks.
    x_big = jax.random.uniform(k_x2, (3000,), jnp.float32, minval=-0.5, maxval=1.5)
    out_big = jax.block_until_ready(
        residual_activation(x_big, coefficients, w_basis, w_spline)
    )
    ref_big = _phi_reference(x_big, coefficients, w_basis, w_spline)
    assert out_big.shape == x_big.shape
    assert np.allclose(np.asarray(out_big), ref_big, rtol=5e-3, atol=5e-3)

    print("KERNEL_OK")
</pallas_src>

<mosaic_0001>
module attributes {stable_mosaic.version = 11 : i64} {
  func.func @_kan_kernel(%arg0: i32, %arg1: memref<30xf32, #tpu.memory_space<smem>>, %arg2: memref<8x128xf32, #tpu.memory_space<vmem>>, %arg3: memref<8x128xf32, #tpu.memory_space<vmem>>) attributes {dimension_semantics = [#tpu.dimension_semantics<parallel>], iteration_bounds = array<i64: 1>, scalar_prefetch = 0 : i64, scratch_operands = 0 : i64, tpu.core_type = #tpu.core_type<tc>, window_params = [{transform_indices = @transform_0, window_bounds = array<i64: 30>}, {transform_indices = @transform_1, window_bounds = array<i64: 8, 128>}, {transform_indices = @transform_2, window_bounds = array<i64: 8, 128>}]} {
    %c0 = arith.constant 0 : index
    %c0_0 = arith.constant 0 : index
    %0 = vector.load %arg2[%c0, %c0_0] : memref<8x128xf32, #tpu.memory_space<vmem>>, vector<8x128xf32>
    %c0_1 = arith.constant 0 : index
    %1 = memref.load %arg1[%c0_1] : memref<30xf32, #tpu.memory_space<smem>>
    %c1 = arith.constant 1 : index
    %2 = memref.load %arg1[%c1] : memref<30xf32, #tpu.memory_space<smem>>
    %c2 = arith.constant 2 : index
    %3 = memref.load %arg1[%c2] : memref<30xf32, #tpu.memory_space<smem>>
    %c3 = arith.constant 3 : index
    %4 = memref.load %arg1[%c3] : memref<30xf32, #tpu.memory_space<smem>>
    %c4 = arith.constant 4 : index
    %5 = memref.load %arg1[%c4] : memref<30xf32, #tpu.memory_space<smem>>
    %c5 = arith.constant 5 : index
    %6 = memref.load %arg1[%c5] : memref<30xf32, #tpu.memory_space<smem>>
    %c6 = arith.constant 6 : index
    %7 = memref.load %arg1[%c6] : memref<30xf32, #tpu.memory_space<smem>>
    %c7 = arith.constant 7 : index
    %8 = memref.load %arg1[%c7] : memref<30xf32, #tpu.memory_space<smem>>
    %c8 = arith.constant 8 : index
    %9 = memref.load %arg1[%c8] : memref<30xf32, #tpu.memory_space<smem>>
    %c9 = arith.constant 9 : index
    %10 = memref.load %arg1[%c9] : memref<30xf32, #tpu.memory_space<smem>>
    %c10 = arith.constant 10 : index
    %11 = memref.load %arg1[%c10] : memref<30xf32, #tpu.memory_space<smem>>
    %c11 = arith.constant 11 : index
    %12 = memref.load %arg1[%c11] : memref<30xf32, #tpu.memory_space<smem>>
    %c12 = arith.constant 12 : index
    %13 = memref.load %arg1[%c12] : memref<30xf32, #tpu.memory_space<smem>>
    %c13 = arith.constant 13 : index
    %14 = memref.load %arg1[%c13] : memref<30xf32, #tpu.memory_space<smem>>
    %c14 = arith.constant 14 : index
    %15 = memref.load %arg1[%c14] : memref<30xf32, #tpu.memory_space<smem>>
    %c15 = arith.constant 15 : index
    %16 = memref.load %arg1[%c15] : memref<30xf32, #tpu.memory_space<smem>>
    %c16 = arith.constant 16 : index
    %17 = memref.load %arg1[%c16] : memref<30xf32, #tpu.memory_space<smem>>
    %c17 = arith.constant 17 : index
    %18 = memref.load %arg1[%c17] : memref<30xf32, #tpu.memory_space<smem>>
    %c18 = arith.constant 18 : index
    %19 = memref.load %arg1[%c18] : memref<30xf32, #tpu.memory_space<smem>>
    %c19 = arith.constant 19 : index
    %20 = memref.load %arg1[%c19] : memref<30xf32, #tpu.memory_space<smem>>
    %c20 = arith.constant 20 : index
    %21 = memref.load %arg1[%c20] : memref<30xf32, #tpu.memory_space<smem>>
    %c21 = arith.constant 21 : index
    %22 = memref.load %arg1[%c21] : memref<30xf32, #tpu.memory_space<smem>>
    %c22 = arith.constant 22 : index
    %23 = memref.load %arg1[%c22] : memref<30xf32, #tpu.memory_space<smem>>
    %c23 = arith.constant 23 : index
    %24 = memref.load %arg1[%c23] : memref<30xf32, #tpu.memory_space<smem>>
    %c24 = arith.constant 24 : index
    %25 = memref.load %arg1[%c24] : memref<30xf32, #tpu.memory_space<smem>>
    %c25 = arith.constant 25 : index
    %26 = memref.load %arg1[%c25] : memref<30xf32, #tpu.memory_space<smem>>
    %c26 = arith.constant 26 : index
    %27 = memref.load %arg1[%c26] : memref<30xf32, #tpu.memory_space<smem>>
    %c27 = arith.constant 27 : index
    %28 = memref.load %arg1[%c27] : memref<30xf32, #tpu.memory_space<smem>>
    %c28 = arith.constant 28 : index
    %29 = memref.load %arg1[%c28] : memref<30xf32, #tpu.memory_space<smem>>
    %c29 = arith.constant 29 : index
    %30 = memref.load %arg1[%c29] : memref<30xf32, #tpu.memory_space<smem>>
    %cst = arith.constant 0.000000e+00 : f32
    %31 = vector.broadcast %cst : f32 to vector<8x128xf32>
    %32 = arith.subf %31, %0 : vector<8x128xf32>
    %33 = math.exp %32 : vector<8x128xf32>
    %cst_2 = arith.constant 1.000000e+00 : f32
    %34 = vector.broadcast %cst_2 : f32 to vector<8x128xf32>
    %35 = arith.addf %34, %33 : vector<8x128xf32>
    %36 = tpu.reciprocal %35 {approx = true} : vector<8x128xf32> -> vector<8x128xf32>
    %37 = arith.mulf %0, %36 : vector<8x128xf32>
    %cst_3 = arith.constant 1.300000e+01 : f32
    %38 = vector.broadcast %cst_3 : f32 to vector<8x128xf32>
    %39 = arith.mulf %0, %38 : vector<8x128xf32>
    %40 = math.floor %39 : vector<8x128xf32>
    %cst_4 = arith.constant 3.000000e+00 : f32
    %cst_5 = arith.constant 9.000000e+00 : f32
    %41 = vector.broadcast %cst_4 : f32 to vector<8x128xf32>
    %42 = arith.maximumf %41, %40 : vector<8x128xf32>
    %43 = vector.broadcast %cst_5 : f32 to vector<8x128xf32>
    %44 = arith.minimumf %43, %42 : vector<8x128xf32>
    %45 = arith.subf %39, %44 : vector<8x128xf32>
    %cst_6 = arith.constant 4.000000e+00 : f32
    %46 = vector.broadcast %cst_6 : f32 to vector<8x128xf32>
    %47 = arith.cmpf oge, %39, %46 : vector<8x128xf32>
    %cst_7 = arith.constant 5.000000e+00 : f32
    %48 = vector.broadcast %cst_7 : f32 to vector<8x128xf32>
    %49 = arith.cmpf oge, %39, %48 : vector<8x128xf32>
    %cst_8 = arith.constant 6.000000e+00 : f32
    %50 = vector.broadcast %cst_8 : f32 to vector<8x128xf32>
    %51 = arith.cmpf oge, %39, %50 : vector<8x128xf32>
    %cst_9 = arith.constant 7.000000e+00 : f32
    %52 = vector.broadcast %cst_9 : f32 to vector<8x128xf32>
    %53 = arith.cmpf oge, %39, %52 : vector<8x128xf32>
    %cst_10 = arith.constant 8.000000e+00 : f32
    %54 = vector.broadcast %cst_10 : f32 to vector<8x128xf32>
    %55 = arith.cmpf oge, %39, %54 : vector<8x128xf32>
    %cst_11 = arith.constant 9.000000e+00 : f32
    %56 = vector.broadcast %cst_11 : f32 to vector<8x128xf32>
    %57 = arith.cmpf oge, %39, %56 : vector<8x128xf32>
    %58 = vector.broadcast %3 : f32 to vector<8x128xf32>
    %59 = vector.broadcast %7 : f32 to vector<8x128xf32>
    %60 = arith.select %47, %59, %58 : vector<8x128xi1>, vector<8x128xf32>
    %61 = vector.broadcast %11 : f32 to vector<8x128xf32>
    %62 = arith.select %49, %61, %60 : vector<8x128xi1>, vector<8x128xf32>
    %63 = vector.broadcast %15 : f32 to vector<8x128xf32>
    %64 = arith.select %51, %63, %62 : vector<8x128xi1>, vector<8x128xf32>
    %65 = vector.broadcast %19 : f32 to vector<8x128xf32>
    %66 = arith.select %53, %65, %64 : vector<8x128xi1>, vector<8x128xf32>
    %67 = vector.broadcast %23 : f32 to vector<8x128xf32>
    %68 = arith.select %55, %67, %66 : vector<8x128xi1>, vector<8x128xf32>
    %69 = vector.broadcast %27 : f32 to vector<8x128xf32>
    %70 = arith.select %57, %69, %68 : vector<8x128xi1>, vector<8x128xf32>
    %71 = vector.broadcast %4 : f32 to vector<8x128xf32>
    %72 = vector.broadcast %8 : f32 to vector<8x128xf32>
    %73 = arith.select %47, %72, %71 : vector<8x128xi1>, vector<8x128xf32>
    %74 = vector.broadcast %12 : f32 to vector<8x128xf32>
    %75 = arith.select %49, %74, %73 : vector<8x128xi1>, vector<8x128xf32>
    %76 = vector.broadcast %16 : f32 to vector<8x128xf32>
    %77 = arith.select %51, %76, %75 : vector<8x128xi1>, vector<8x128xf32>
    %78 = vector.broadcast %20 : f32 to vector<8x128xf32>
    %79 = arith.select %53, %78, %77 : vector<8x128xi1>, vector<8x128xf32>
    %80 = vector.broadcast %24 : f32 to vector<8x128xf32>
    %81 = arith.select %55, %80, %79 : vector<8x128xi1>, vector<8x128xf32>
    %82 = vector.broadcast %28 : f32 to vector<8x128xf32>
    %83 = arith.select %57, %82, %81 : vector<8x128xi1>, vector<8x128xf32>
    %84 = vector.broadcast %5 : f32 to vector<8x128xf32>
    %85 = vector.broadcast %9 : f32 to vector<8x128xf32>
    %86 = arith.select %47, %85, %84 : vector<8x128xi1>, vector<8x128xf32>
    %87 = vector.broadcast %13 : f32 to vector<8x128xf32>
    %88 = arith.select %49, %87, %86 : vector<8x128xi1>, vector<8x128xf32>
    %89 = vector.broadcast %17 : f32 to vector<8x128xf32>
    %90 = arith.select %51, %89, %88 : vector<8x128xi1>, vector<8x128xf32>
    %91 = vector.broadcast %21 : f32 to vector<8x128xf32>
    %92 = arith.select %53, %91, %90 : vector<8x128xi1>, vector<8x128xf32>
    %93 = vector.broadcast %25 : f32 to vector<8x128xf32>
    %94 = arith.select %55, %93, %92 : vector<8x128xi1>, vector<8x128xf32>
    %95 = vector.broadcast %29 : f32 to vector<8x128xf32>
    %96 = arith.select %57, %95, %94 : vector<8x128xi1>, vector<8x128xf32>
    %97 = vector.broadcast %6 : f32 to vector<8x128xf32>
    %98 = vector.broadcast %10 : f32 to vector<8x128xf32>
    %99 = arith.select %47, %98, %97 : vector<8x128xi1>, vector<8x128xf32>
    %100 = vector.broadcast %14 : f32 to vector<8x128xf32>
    %101 = arith.select %49, %100, %99 : vector<8x128xi1>, vector<8x128xf32>
    %102 = vector.broadcast %18 : f32 to vector<8x128xf32>
    %103 = arith.select %51, %102, %101 : vector<8x128xi1>, vector<8x128xf32>
    %104 = vector.broadcast %22 : f32 to vector<8x128xf32>
    %105 = arith.select %53, %104, %103 : vector<8x128xi1>, vector<8x128xf32>
    %106 = vector.broadcast %26 : f32 to vector<8x128xf32>
    %107 = arith.select %55, %106, %105 : vector<8x128xi1>, vector<8x128xf32>
    %108 = vector.broadcast %30 : f32 to vector<8x128xf32>
    %109 = arith.select %57, %108, %107 : vector<8x128xi1>, vector<8x128xf32>
    %110 = arith.mulf %109, %45 : vector<8x128xf32>
    %111 = arith.addf %110, %96 : vector<8x128xf32>
    %112 = arith.mulf %111, %45 : vector<8x128xf32>
    %113 = arith.addf %112, %83 : vector<8x128xf32>
    %114 = arith.mulf %113, %45 : vector<8x128xf32>
    %115 = arith.addf %114, %70 : vector<8x128xf32>
    %116 = vector.broadcast %1 : f32 to vector<8x128xf32>
    %117 = arith.mulf %116, %37 : vector<8x128xf32>
    %118 = vector.broadcast %2 : f32 to vector<8x128xf32>
    %119 = arith.mulf %118, %115 : vector<8x128xf32>
    %120 = arith.addf %117, %119 : vector<8x128xf32>
    %c0_12 = arith.constant 0 : index
    %c0_13 = arith.constant 0 : index
    %121 = vector.load %arg3[%c0_12, %c0_13] : memref<8x128xf32, #tpu.memory_space<vmem>>, vector<8x128xf32>
    tpu.vector_store %arg3[%c0_12, %c0_13], %120 {strides = array<i32>} : memref<8x128xf32, #tpu.memory_space<vmem>>, vector<8x128xf32>,
    return
  }
  func.func @transform_0(%arg0: i32) -> i32 {
    %c0_i32 = arith.constant 0 : i32
    %c0_i32_0 = arith.constant 0 : i32
    return %c0_i32 : i32
  }
  func.func @transform_1(%arg0: i32) -> (i32, i32) {
    %c0_i32 = arith.constant 0 : i32
    %c0_i32_0 = arith.constant 0 : i32
    return %arg0, %c0_i32 : i32, i32
  }
  func.func @transform_2(%arg0: i32) -> (i32, i32) {
    %c0_i32 = arith.constant 0 : i32
    %c0_i32_0 = arith.constant 0 : i32
    return %arg0, %c0_i32 : i32, i32
  }
}

</mosaic_0001>

<bundles_post_ra>
// kernel: residual_activation.1
= control target key start
LH: loop header
LB: loop body
LE: loop exit
PB: predicated region body
PF: predicated region fallthrough
CT: control target
= control target key end

     0   :  { %7 = vsyncpa [#allocation3], 0  ;;  %s349_s0 = inlined_call_operand.vmem [shape: f32[30], index: 0, kind: input, shape index: {}]   ;;  %s350_s1 = inlined_call_operand.vmem [shape: f32[8,128], index: 1, kind: input, shape index: {}]   ;;  %s351_s2 = inlined_call_operand.vmem [shape: f32[8,128], index: 2, kind: output, shape index: {}]  }
   0x1   :  { %s14_s11 = sshll.u32 %s349_s0, 4  ;;  %s15_s11 = int_to_ptr.vmem [resolvable:$true] %s14_s11 }
   0x2   :  { %s175_s12 = scalar_lea.vmem %s15_s11, 16  ;;  %p180_p1 = scmp.lt.s32.totalorder %s15_s11, %s15_s11 }
   0x3   :  { %p176_p0 = scmp.ne.s32.totalorder %s15_s11, %s175_s12  ;;  %p181_p2 = scmp.lt.s32.totalorder %s175_s12, %s175_s12 }
   0x5   :  { %p182_p3 = por %p181_p2, %p180_p1 }
   0x7   :  { %p183_p4 = pnand %p182_p3, %p176_p0 }
   0x9   :  { %186 = shalt.err (!%p183_p4)
}
   0xa   :  { %s189_s13 = smov [#allocation2]  }
   0xb   :  { %17 = dma.vmem_to_smem %s15_s11, 16, %s189_s13, [#allocation3]  }
   0xc   :  { %187 = dma.done.wait [#allocation3], 16  }
   0xd   :  { %188 = vsyncadd [#allocation3], 4294967280 }
   0xe   :  { %23 = sfence }
   0xf   :  { %v211_v0 = vld [vmem:[%s350_s1] sm:$0xff]  ;;  %s213_s16 = sld [smem:[#allocation2 + $0x2]]  ;;  %s215_s0 = sld [smem:[#allocation2 + $0x3]] }
  0x10   :  { %v55_v1 = vsub.f32 0.0, %v211_v0  ;;  %s218_s17 = sld [smem:[#allocation2 + $0x4]]  ;;  %s220_s18 = sld [smem:[#allocation2 + $0x5]]  ;;  %v223_v2 = vmul.f32 13.0, %v211_v0 }
  0x11   :  { %s225_s19 = sld [smem:[#allocation2 + $0x6]]  ;;  %s147_s20 = sld [smem:[#allocation2 + $0x7]] }
  0x12   :  { %v56_v3 = vmul.f32 1.442695, %v55_v1  ;;  %s148_s1 = sld [smem:[#allocation2 + $0x8]]  ;;  %s149_s21 = sld [smem:[#allocation2 + $0x9]]  ;;  %v62_v4 = vfloor.f32 %v223_v2  ;;  %vm66_vm0 = vcmp.ge.f32.partialorder %v223_v2, 4.0  ;;  %vm67_vm1 = vcmp.ge.f32.partialorder %v223_v2, 5.0 }
  0x13   :  { %s227_s22 = sld [smem:[#allocation2 + $0xb]]  ;;  %s229_s23 = sld [smem:[#allocation2 + $0xc]]  ;;  %vm68_vm2 = vcmp.ge.f32.partialorder %v223_v2, 6.0  ;;  %vm69_vm3 = vcmp.ge.f32.partialorder %v223_v2, 7.0  ;;  %vm70_vm4 = vcmp.ge.f32.partialorder %v223_v2, 8.0  ;;  %vm71_vm5 = vcmp.ge.f32.partialorder %v223_v2, 9.0 }
  0x14   :  { %171 = vpow2.f32 %v56_v3  ;;  %s231_s24 = sld [smem:[#allocation2 + $0xd]]  ;;  %s234_s25 = sld [smem:[#allocation2 + $0xa]]  ;;  %v63_v9 = vmax.f32 %v62_v4, 3.0 }
  0x15   :  { %s236_s26 = sld [smem:[#allocation2 + $0xf]]  ;;  %s238_s27 = sld [smem:[#allocation2 + $0x10]]  ;;  %v85_v5 = vstv %s215_s0  ;;  %v72_v16 = vstv %s213_s16 }
  0x16   :  { %s240_s28 = sld [smem:[#allocation2 + $0x11]]  ;;  %v98_v6 = vstv %s218_s17  ;;  %v111_v7 = vstv %s220_s18  ;;  %s246_s29 = sld [smem:[#allocation2 + $0xe]]  ;;  %v64_v27 = vmin.f32 %v63_v9, 9.0 }
  0x17   :  { %s248_s30 = sld [smem:[#allocation2 + $0x13]]  ;;  %v86_v8 = vstv %s147_s20  ;;  %s250_s3 = sld [smem:[#allocation2 + $0x14]]  ;;  %v73_v17 = vstv %s225_s19 }
  0x18   :  { %s252_s4 = sld [smem:[#allocation2 + $0x15]]  ;;  %v99_v10 = vstv %s148_s1  ;;  %v112_v11 = vstv %s149_s21  ;;  %s255_s5 = sld [smem:[#allocation2 + $0x17]]  ;;  %v87_v12 = vsel %vm66_vm0, %v86_v8, %v85_v5  ;;  %v74_v28 = vsel %vm66_vm0, %v73_v17, %v72_v16 }
  0x19   :  { %v88_v13 = vstv %s227_s22  ;;  %v100_v14 = vsel %vm66_vm0, %v99_v10, %v98_v6  ;;  %v113_v15 = vsel %vm66_vm0, %v112_v11, %v111_v7  ;;  %s264_s6 = sld [smem:[#allocation2 + $0x18]]  ;;  %s266_s7 = sld [smem:[#allocation2 + $0x19]]  ;;  %v101_v18 = vstv %s229_s23 }
  0x1a   :  { %v114_v19 = vstv %s231_s24  ;;  %s272_s8 = sld [smem:[#allocation2 + $0x12]]  ;;  %v102_v20 = vsel %vm67_vm1, %v101_v18, %v100_v14  ;;  %s280_s9 = sld [smem:[#allocation2 + $0x1c]]  ;;  %v89_v22 = vsel %vm67_vm1, %v88_v13, %v87_v12  ;;  %v75_v29 = vstv %s234_s25 }
  0x1b   :  { %v115_v21 = vsel %vm67_vm1, %v114_v19, %v113_v15  ;;  %s282_s10 = sld [smem:[#allocation2 + $0x1d]]  ;;  %v90_v23 = vstv %s236_s26  ;;  %v103_v24 = vstv %s238_s27  ;;  %s289_s11 = sld [smem:[#allocation2 + $0x1b]]  ;;  %v76_v38 = vsel %vm67_vm1, %v75_v29, %v74_v28 }
  0x1c   :  { %v116_v25 = vstv %s240_s28  ;;  %v104_v30 = vsel %vm68_vm2, %v103_v24, %v102_v20  ;;  %s296_s12 = sld [smem:[#allocation2 + $0x16]]  ;;  %v91_v34 = vsel %vm68_vm2, %v90_v23, %v89_v22  ;;  %v77_v39 = vstv %s246_s29  ;;  %s166_s13 = sld [smem:[#allocation2 + $0x1a]] }
  0x1d   :  { %v105_v32 = vstv %s250_s3  ;;  %v117_v33 = vsel %vm68_vm2, %v116_v25, %v115_v21  ;;  %v92_v35 = vstv %s248_s30  ;;  %v65_v41 = vsub.f32 %v223_v2, %v64_v27  ;;  %s25_s14 = sld [smem:[#allocation2]]  ;;  %s141_s15 = sld [smem:[#allocation2 + $0x1]] }
  0x1e   :  { %v172_v26 = vpop.eup %171  ;;  %v106_v36 = vsel %vm69_vm3, %v105_v32, %v104_v30  ;;  %v118_v37 = vstv %s252_s4  ;;  %v93_v44 = vsel %vm69_vm3, %v92_v35, %v91_v34  ;;  %v94_v45 = vstv %s255_s5 }
  0x1f   :  { %v58_v31 = vadd.f32 1.0, %v172_v26  ;;  %v107_v40 = vstv %s264_s6  ;;  %v119_v43 = vsel %vm69_vm3, %v118_v37, %v117_v33  ;;  %v120_v47 = vstv %s266_s7 }
  0x20   :  { %v108_v42 = vsel %vm70_vm4, %v107_v40, %v106_v36  ;;  %v109_v46 = vstv %s280_s9  ;;  %v78_v48 = vsel %vm68_vm2, %v77_v39, %v76_v38  ;;  %v79_v49 = vstv %s272_s8 }
  0x21   :  { %173 = vrcp.f32 %v58_v31  ;;  %v121_v50 = vsel %vm70_vm4, %v120_v47, %v119_v43  ;;  %v122_v51 = vstv %s282_s10  ;;  %v110_v52 = vsel %vm71_vm5, %v109_v46, %v108_v42 }
  0x22   :  { %v123_v53 = vsel %vm71_vm5, %v122_v51, %v121_v50  ;;  %v95_v54 = vsel %vm70_vm4, %v94_v45, %v93_v44  ;;  %v96_v55 = vstv %s289_s11  ;;  %v80_v57 = vsel %vm69_vm3, %v79_v49, %v78_v48 }
  0x23   :  { %v124_v56 = vmul.f32 %v123_v53, %v65_v41  ;;  %v81_v58 = vstv %s296_s12  ;;  %v97_v60 = vsel %vm71_vm5, %v96_v55, %v95_v54  ;;  %v83_v62 = vstv %s166_s13 }
  0x24   :  { %v82_v61 = vsel %vm70_vm4, %v81_v58, %v80_v57  ;;  %v130_v6 = vstv %s25_s14  ;;  %v132_v8 = vstv %s141_s15 }
  0x25   :  { %v125_v59 = vadd.f32 %v124_v56, %v110_v52  ;;  %v84_v5 = vsel %vm71_vm5, %v83_v62, %v82_v61 }
  0x27   :  { %v126_v63 = vmul.f32 %v125_v59, %v65_v41 }
  0x29   :  { %v127_v4 = vadd.f32 %v126_v63, %v97_v60 }
  0x2b   :  { %v174_v1 = vpop.eup %173  ;;  %v128_v7 = vmul.f32 %v127_v4, %v65_v41 }
  0x2c   :  { %v60_v3 = vmul.f32 %v174_v1, %v211_v0 }
  0x2d   :  { %v129_v9 = vadd.f32 %v128_v7, %v84_v5 }
  0x2e   :  { %v131_v10 = vmul.f32 %v130_v6, %v60_v3 }
  0x2f   :  { %v133_v11 = vmul.f32 %v132_v8, %v129_v9 }
  0x31   :  { %v134_v12 = vadd.f32 %v133_v11, %v131_v10 }
  0x33   :  { %135 = vst [vmem:[%s351_s2] sm:$0xff] %v134_v12 }
  0x34   :  { %140 = vsyncpa [#allocation3], 1 }

</bundles_post_ra>
